<compile_context>
chip_gen: v7x
topology: tpu7x:2x2x1
jax: 0.10.0
libtpu: 0.0.40
codegen_flags: <defaults>
</compile_context>

<pallas_src>
import functools

import jax
import jax.numpy as jnp
from jax.experimental import pallas as pl
from jax.experimental.pallas import tpu as pltpu

_MIB = 1024 * 1024


def _round_up(v, m):
    return (v + m - 1) // m * m


def _vmem_capacity_bytes():
    try:
        return int(pltpu.get_tpu_info().vmem_capacity_bytes)
    except Exception:
        return 64 * _MIB  # conservative fallback (v7x per-TensorCore VMEM)


def _num_tensorcores():
    # Best-effort query; used only for work routing, never for correctness.
    try:
        info = pltpu.get_tpu_info()
        for attr in ("num_cores", "tensorcores_per_chip", "core_count"):
            v = getattr(info, attr, None)
            if v:
                return max(1, int(v))
    except Exception:
        pass
    try:
        d = jax.devices()[0]
        for attr in ("num_cores", "core_count"):
            v = getattr(d, attr, None)
            if v:
                return max(1, int(v))
    except Exception:
        pass
    return 1


def _excite(pooled_f32, w1t_ref, w2t_ref):
    """(1, C) pooled means -> (1, C) sigmoid gates, f32."""
    h = jnp.dot(pooled_f32.astype(w1t_ref.dtype), w1t_ref[...],
                preferred_element_type=jnp.float32)
    h = jnp.maximum(h, 0.0)
    s = jnp.dot(h.astype(w2t_ref.dtype), w2t_ref[...],
                preferred_element_type=jnp.float32)
    return jax.nn.sigmoid(s)


def se_fused_kernel(x_ref, w1t_ref, w2t_ref, o_ref, *, inv_hw):
    # x_ref: (1, C, HW) — NCHW kept: spatial on lanes, channels on sublanes.
    x = x_ref[...]
    pooled = jnp.sum(x, axis=-1, dtype=jnp.float32) * inv_hw         # (1, C)
    s = _excite(pooled, w1t_ref, w2t_ref)                            # (1, C)
    o_ref[...] = x * s[:, :, None].astype(o_ref.dtype)               # lane bcast


def se_pool_kernel(x_ref, sum_ref, *, hw, t_hw):
    # Two-pass pass 1: tiled spatial sum.  The f32 output block stays resident
    # across the (arbitrary) spatial-tile axis and acts as the accumulator.
    h = pl.program_id(1)

    @pl.when(h == 0)
    def _init():
        sum_ref[...] = jnp.zeros_like(sum_ref)

    x = x_ref[...]                                                   # (1, C, t_hw)
    if hw % t_hw != 0:
        # Mask the ragged last tile in-kernel instead of padding x in HBM.
        col = jax.lax.broadcasted_iota(jnp.int32, x.shape, 2) + h * t_hw
        x = jnp.where(col < hw, x, jnp.zeros_like(x))
    sum_ref[...] += jnp.sum(x, axis=-1, dtype=jnp.float32)[:, None, :]


def se_rescale_kernel(x_ref, gate_ref, o_ref):
    # Two-pass pass 2: x * gate, fully tiled over (batch, spatial tiles).
    o_ref[...] = x_ref[...] * gate_ref[...]


def squeeze_excitation(x, w1, w2, *, force_two_pass=False, hw_tile=None):
    """Squeeze-Excitation forward.

    x : (B, C, H, W)  NCHW, matching the PyTorch module
    w1: (C//r, C)     first bias-free nn.Linear weight (out_features, in_features)
    w2: (C, C//r)     second bias-free nn.Linear weight
    """
    B, C, H, W = x.shape
    HW = H * W
    Cr = w1.shape[0]
    itemsize = jnp.dtype(x.dtype).itemsize

    x3 = x.reshape(B, C, HW)                      # free reshape (no HBM pass)
    w1t = w1.T.astype(x.dtype)                    # (C, Cr)
    w2t = w2.T.astype(x.dtype)                    # (Cr, C)
    w_bytes = 2 * 2 * C * Cr * itemsize           # both weights, double-buffered

    cap = _vmem_capacity_bytes()
    budget = max(int(cap * 0.7), 32 * _MIB)

    # Fused one-pass path: one batch element resident per grid step
    # (input + output double-buffered), weights resident.
    fused_needed = 4 * HW * C * itemsize + w_bytes + 2 * _MIB

    # v7x has 2 TensorCores; a (B,) grid with tiny B leaves a core idle, so
    # prefer the fully tiled two-pass path for large small-B inputs there.
    cores = _num_tensorcores()
    prefer_split = cores > 1 and B < cores and HW * C * itemsize >= 4 * _MIB

    use_fused = (not force_two_pass) and fused_needed <= budget and not prefer_split

    if use_fused:
        vmem_limit = int(min(max(fused_needed, 32 * _MIB), budget))
        out3 = pl.pallas_call(
            functools.partial(se_fused_kernel, inv_hw=1.0 / HW),
            out_shape=jax.ShapeDtypeStruct((B, C, HW), x.dtype),
            grid_spec=pltpu.PrefetchScalarGridSpec(
                num_scalar_prefetch=0,
                grid=(B,),
                in_specs=[
                    pl.BlockSpec((1, C, HW), lambda b: (b, 0, 0)),
                    pl.BlockSpec((C, Cr), lambda b: (0, 0)),
                    pl.BlockSpec((Cr, C), lambda b: (0, 0)),
                ],
                out_specs=pl.BlockSpec((1, C, HW), lambda b: (b, 0, 0)),
            ),
            compiler_params=pltpu.CompilerParams(
                dimension_semantics=("parallel",),
                vmem_limit_bytes=vmem_limit,
            ),
            cost_estimate=pl.CostEstimate(
                flops=2 * B * HW * C + 4 * B * C * Cr,
                transcendentals=B * C,
                bytes_accessed=2 * B * HW * C * itemsize + 2 * C * Cr * itemsize,
            ),
        )(x3, w1t, w2t)
        return out3.reshape(B, C, H, W)

    # ----- Two-pass path: tiled pool, tiny XLA excite, tiled rescale. -----
    if hw_tile is not None:
        t_hw = _round_up(max(int(hw_tile), 1), 128)
    else:
        target_block_bytes = 8 * _MIB if budget >= 64 * _MIB else 4 * _MIB
        t_hw = max(128, (target_block_bytes // max(C * itemsize, 1)) // 128 * 128)
    if t_hw >= HW:
        t_hw = HW                                  # full extent: no 128 constraint
    n_hw = pl.cdiv(HW, t_hw)
    block_bytes = C * t_hw * itemsize

    pool_vmem = int(min(max(3 * block_bytes + 2 * _MIB, 32 * _MIB), budget))
    rescale_vmem = int(min(max(5 * block_bytes + 2 * _MIB, 32 * _MIB), budget))

    sums = pl.pallas_call(
        functools.partial(se_pool_kernel, hw=HW, t_hw=t_hw),
        out_shape=jax.ShapeDtypeStruct((B, 1, C), jnp.float32),
        grid_spec=pltpu.PrefetchScalarGridSpec(
            num_scalar_prefetch=0,
            grid=(B, n_hw),
            in_specs=[pl.BlockSpec((1, C, t_hw), lambda b, h: (b, 0, h))],
            out_specs=pl.BlockSpec((1, 1, C), lambda b, h: (b, 0, 0)),
        ),
        compiler_params=pltpu.CompilerParams(
            dimension_semantics=("parallel", "arbitrary"),
            vmem_limit_bytes=pool_vmem,
        ),
        cost_estimate=pl.CostEstimate(
            flops=B * HW * C,
            transcendentals=0,
            bytes_accessed=B * HW * C * itemsize + B * C * 4,
        ),
    )(x3)

    # Excitation MLP hoisted out of the kernels: one tiny batched matmul chain
    # in plain XLA (the op is HBM-bound; this removes the skinny (1,C) MXU use
    # and the weight buffers from the pool kernel's VMEM).
    means = sums.reshape(B, C) * (1.0 / HW)                          # f32
    hid = jnp.maximum(means @ w1.T.astype(jnp.float32), 0.0)        # (B, Cr)
    gates = jax.nn.sigmoid(hid @ w2.T.astype(jnp.float32))          # (B, C)
    gates3 = gates.astype(x.dtype).reshape(B, C, 1)

    out3 = pl.pallas_call(
        se_rescale_kernel,
        out_shape=jax.ShapeDtypeStruct((B, C, HW), x.dtype),
        grid_spec=pltpu.PrefetchScalarGridSpec(
            num_scalar_prefetch=0,
            grid=(B, n_hw),
            in_specs=[
                pl.BlockSpec((1, C, t_hw), lambda b, h: (b, 0, h)),
                pl.BlockSpec((1, C, 1), lambda b, h: (b, 0, 0)),
            ],
            out_specs=pl.BlockSpec((1, C, t_hw), lambda b, h: (b, 0, h)),
        ),
        compiler_params=pltpu.CompilerParams(
            dimension_semantics=("parallel", "parallel"),
            vmem_limit_bytes=rescale_vmem,
        ),
        cost_estimate=pl.CostEstimate(
            flops=B * HW * C,
            transcendentals=0,
            bytes_accessed=2 * B * HW * C * itemsize + B * C * itemsize,
        ),
    )(x3, gates3)
    return out3.reshape(B, C, H, W)


def reference_se(x, w1, w2):
    y = jnp.mean(x, axis=(2, 3))                    # (B, C)
    h = jnp.maximum(y @ w1.T, 0.0)                  # (B, C//r)
    s = jax.nn.sigmoid(h @ w2.T)                    # (B, C)
    return x * s[:, :, None, None]


if __name__ == "__main__":
    key = jax.random.PRNGKey(0)
    k_x, k_w1, k_w2 = jax.random.split(key, 3)

    B, C, H, W = 2, 32, 16, 16
    reduction = 16
    Cr = C // reduction  # 2

    x = jax.random.normal(k_x, (B, C, H, W), dtype=jnp.float32)
    # PyTorch nn.Linear layout: (out_features, in_features), bias-free per spec.
    w1 = jax.random.normal(k_w1, (Cr, C), dtype=jnp.float32) * (1.0 / jnp.sqrt(C))
    w2 = jax.random.normal(k_w2, (C, Cr), dtype=jnp.float32) * (1.0 / jnp.sqrt(Cr))

    ref = reference_se(x, w1, w2)

    # Fused single-pass path (auto-selected at this size).
    out_fused = jax.block_until_ready(jax.jit(squeeze_excitation)(x, w1, w2))
    assert out_fused.shape == (B, C, H, W)
    assert jnp.allclose(out_fused, ref, atol=1e-5, rtol=1e-5), "fused path mismatch"

    # Two-pass path forced with multiple (even) spatial tiles.
    se_two = jax.jit(
        functools.partial(squeeze_excitation, force_two_pass=True, hw_tile=128)
    )
    out_two = jax.block_until_ready(se_two(x, w1, w2))
    assert out_two.shape == (B, C, H, W)
    assert jnp.allclose(out_two, ref, atol=1e-5, rtol=1e-5), "two-pass path mismatch"

    # Two-pass path with a ragged last spatial tile (HW=143, tile=128) to
    # exercise the in-kernel masking that replaced jnp.pad.
    H2, W2 = 13, 11
    x2 = jax.random.normal(k_x, (B, C, H2, W2), dtype=jnp.float32)
    ref2 = reference_se(x2, w1, w2)
    out_ragged = jax.block_until_ready(se_two(x2, w1, w2))
    assert out_ragged.shape == (B, C, H2, W2)
    assert jnp.allclose(out_ragged, ref2, atol=1e-5, rtol=1e-5), "ragged-tile mismatch"

    print("KERNEL_OK")
</pallas_src>

<mosaic_0001>
module attributes {stable_mosaic.version = 11 : i64} {
  func.func @se_fused_kernel(%arg0: i32, %arg1: memref<1x32x256xf32, #tpu.memory_space<vmem>>, %arg2: memref<32x2xf32, #tpu.memory_space<vmem>>, %arg3: memref<2x32xf32, #tpu.memory_space<vmem>>, %arg4: memref<1x32x256xf32, #tpu.memory_space<vmem>>) attributes {dimension_semantics = [#tpu.dimension_semantics<parallel>], iteration_bounds = array<i64: 2>, scalar_prefetch = 0 : i64, scratch_operands = 0 : i64, tpu.core_type = #tpu.core_type<tc>, window_params = [{transform_indices = @transform_0, window_bounds = array<i64: 1, 32, 256>}, {pipeline_mode = #tpu.pipeline_mode<synchronous>, transform_indices = @transform_1, window_bounds = array<i64: 32, 2>}, {pipeline_mode = #tpu.pipeline_mode<synchronous>, transform_indices = @transform_2, window_bounds = array<i64: 2, 32>}, {transform_indices = @transform_3, window_bounds = array<i64: 1, 32, 256>}]} {
    %c0 = arith.constant 0 : index
    %c0_0 = arith.constant 0 : index
    %c0_1 = arith.constant 0 : index
    %0 = vector.load %arg1[%c0, %c0_0, %c0_1] : memref<1x32x256xf32, #tpu.memory_space<vmem>>, vector<1x32x256xf32>
    %cst = arith.constant dense<0.000000e+00> : vector<1x32xf32>
    %1 = vector.multi_reduction <add>, %0, %cst [2] : vector<1x32x256xf32> to vector<1x32xf32>
    %cst_2 = arith.constant 3.906250e-03 : f32
    %2 = vector.broadcast %cst_2 : f32 to vector<1x32xf32>
    %3 = arith.mulf %1, %2 : vector<1x32xf32>
    %c0_3 = arith.constant 0 : index
    %c0_4 = arith.constant 0 : index
    %4 = vector.load %arg2[%c0_3, %c0_4] : memref<32x2xf32, #tpu.memory_space<vmem>>, vector<32x2xf32>
    %cst_5 = arith.constant dense<0.000000e+00> : vector<1x2xf32>
    %5 = tpu.matmul %3, %4, %cst_5 {dimension_numbers = #tpu.dot_dimension_numbers<[1], [0], [0], [1], [0, 0, 1, 1], [], []>} : vector<1x32xf32>, vector<32x2xf32>, vector<1x2xf32> -> vector<1x2xf32>
    %cst_6 = arith.constant 0.000000e+00 : f32
    %6 = vector.broadcast %cst_6 : f32 to vector<1x2xf32>
    %7 = arith.maximumf %5, %6 : vector<1x2xf32>
    %c0_7 = arith.constant 0 : index
    %c0_8 = arith.constant 0 : index
    %8 = vector.load %arg3[%c0_7, %c0_8] : memref<2x32xf32, #tpu.memory_space<vmem>>, vector<2x32xf32>
    %cst_9 = arith.constant dense<0.000000e+00> : vector<1x32xf32>
    %9 = tpu.matmul %7, %8, %cst_9 {dimension_numbers = #tpu.dot_dimension_numbers<[1], [0], [0], [1], [0, 0, 1, 1], [], []>} : vector<1x2xf32>, vector<2x32xf32>, vector<1x32xf32> -> vector<1x32xf32>
    %10 = arith.negf %9 : vector<1x32xf32>
    %11 = math.exp %10 : vector<1x32xf32>
    %cst_10 = arith.constant 1.000000e+00 : f32
    %12 = vector.broadcast %cst_10 : f32 to vector<1x32xf32>
    %13 = arith.addf %12, %11 : vector<1x32xf32>
    %14 = arith.divf %12, %13 : vector<1x32xf32>
    %15 = vector.shape_cast %14 : vector<1x32xf32> to vector<1x32x1xf32>
    %16 = vector.broadcast %15 : vector<1x32x1xf32> to vector<1x32x256xf32>
    %17 = arith.mulf %0, %16 : vector<1x32x256xf32>
    %c0_11 = arith.constant 0 : index
    %c0_12 = arith.constant 0 : index
    %c0_13 = arith.constant 0 : index
    %18 = vector.load %arg4[%c0_11, %c0_12, %c0_13] : memref<1x32x256xf32, #tpu.memory_space<vmem>>, vector<1x32x256xf32>
    tpu.vector_store %arg4[%c0_11, %c0_12, %c0_13], %17 {strides = array<i32>} : memref<1x32x256xf32, #tpu.memory_space<vmem>>, vector<1x32x256xf32>,
    return
  }
  func.func @transform_0(%arg0: i32) -> (i32, i32, i32) {
    %c0_i32 = arith.constant 0 : i32
    %c0_i32_0 = arith.constant 0 : i32
    %c0_i32_1 = arith.constant 0 : i32
    return %arg0, %c0_i32, %c0_i32_0 : i32, i32, i32
  }
  func.func @transform_1(%arg0: i32) -> (i32, i32) {
    %c0_i32 = arith.constant 0 : i32
    %c0_i32_0 = arith.constant 0 : i32
    %c0_i32_1 = arith.constant 0 : i32
    return %c0_i32, %c0_i32_0 : i32, i32
  }
  func.func @transform_2(%arg0: i32) -> (i32, i32) {
    %c0_i32 = arith.constant 0 : i32
    %c0_i32_0 = arith.constant 0 : i32
    %c0_i32_1 = arith.constant 0 : i32
    return %c0_i32, %c0_i32_0 : i32, i32
  }
  func.func @transform_3(%arg0: i32) -> (i32, i32, i32) {
    %c0_i32 = arith.constant 0 : i32
    %c0_i32_0 = arith.constant 0 : i32
    %c0_i32_1 = arith.constant 0 : i32
    return %arg0, %c0_i32, %c0_i32_0 : i32, i32, i32
  }
}

</mosaic_0001>

<bundles_post_ra>
// kernel: squeeze_excitation.1
= control target key start
LH: loop header
LB: loop body
LE: loop exit
PB: predicated region body
PF: predicated region fallthrough
CT: control target
= control target key end

     0   :  { %s571_s12 = smov 0   ;;  %s642_s0 = inlined_call_operand.vmem [shape: f32[2,32,256], index: 0, kind: input, shape index: {}]   ;;  %s643_s1 = inlined_call_operand.vmem [shape: f32[32,2], index: 1, kind: input, shape index: {}]   ;;  %s644_s2 = inlined_call_operand.vmem [shape: f32[2,32], index: 2, kind: input, shape index: {}]   ;;  %s645_s3 = inlined_call_operand.vmem [shape: f32[2,32,256], index: 3, kind: output, shape index: {}]  }
   0x1 LB: > { %s479_s13 = sadd.s32 4294967295, %s546_s12   ;;  %p483_p0 = scmp.ge.s32.totalorder %s546_s12, 1  ;;  %s546_s12 = sphi %s571_s12, %s13_s12  }
   0x2   : > { %p137_p1 = scmp.lt.s32.totalorder %s546_s12, 3 }
   0x4   : > { %p138_p2 = pnand %p483_p0, %p137_p1 }
   0x5   : > { %p161_p3 = scmp.lt.s32.totalorder (!%p138_p2), %s479_s13, 1  ;;  %v195_v12 = vld [vmem:[%s643_s1] sm:$0xff] (!%p138_p2)  ;;  %v196_v13 = vld [vmem:[%s643_s1 + $0x8] sm:$0xff] (!%p138_p2)  ;;  %v548_v15 = vmov (!%p138_p2), 0.0|0.0   ;;  %v197_v16 = vld [vmem:[%s643_s1 + $0x10] sm:$0xff] (!%p138_p2)  ;;  %vm549_vm0 = vmmov (!%p138_p2), 0   ;;  %v203_v20 = vlaneseq (!%p138_p2) }
   0x6   : > { %141 = sbr.rel (%p138_p2) target bundleno = 752 (0x2f0), region = 32  ;;  %v520_v14 = vpack.c.bf16 (!%p138_p2), %v196_v13, %v195_v12  ;;  %519 = vmatprep.subr.bf16.mxu0 (!%p138_p2), %v548_v15  ;;  %v198_v17 = vld [vmem:[%s643_s1 + $0x18] sm:$0xff] (!%p138_p2)  ;;  %v550_v19 = vmov (!%p138_p2), 0.0   ;;  %vm214_vm1 = vcmask (!%p138_p2), 130112   ;;  %vm221_vm2 = vcmask (!%p138_p2), 195712  }
   0x7   : > { %v523_v18 = vpack.c.bf16 (!%p138_p2), %v198_v17, %v197_v16  ;;  %511 = vmatprep.mubr.msk.f32.mxu0 (!%p138_p2), %vm549_vm0, %v550_v19  ;;  %514 = vmatprep.subr.mxu1 (!%p138_p2), %v550_v19  ;;  %v204_v21 = vand.u32 (!%p138_p2), 127, %v203_v20  ;;  %v206_v22 = vshrl.u32 (!%p138_p2), %v203_v20, 7  ;;  %vm228_vm3 = vcmask (!%p138_p2), 261312   ;;  %v304_v45 = vld [vmem:[%s644_s2] sm:$0x3] (!%p138_p2) }
   0x8   : > { %521 = vmatpush3.bf16.msra.mxu0 (!%p138_p2), %v520_v14  ;;  %516 = vmatprep.mubr.msk.f32.mxu1 (!%p138_p2), %vm549_vm0, %v550_v19  ;;  %vm230_vm4 = vcmask (!%p138_p2), 261120   ;;  %vm309_vm5 = vcmask (!%p138_p2), 1041408   ;;  %vm305_vm6 = vcmask (!%p138_p2), 15360  }
   0x9   : > { %522 = vmatprep.subr.bf16.mxu0 (!%p138_p2), %v548_v15  ;;  %v209_v23 = vadd.s32 (!%p138_p2), 4294967288, %v204_v21  ;;  %v216_v25 = vadd.s32 (!%p138_p2), 4294967280, %v204_v21  ;;  %v223_v26 = vadd.s32 (!%p138_p2), 4294967272, %v204_v21  ;;  %v207_v28 = vsub.s32 (!%p138_p2), %v204_v21, %v206_v22  ;;  %515 = vmatpush3.msk.msra.mxu1 (!%p138_p2), %vm309_vm5, %v304_v45 }
   0xa   : > { %v391_v54 = vsub.s32 (!%p138_p2), 0, %v206_v22 }
   0xb   : > { %v212_v30 = vsub.s32 (!%p138_p2), %v209_v23, %v206_v22  ;;  %v219_v31 = vsub.s32 (!%p138_p2), %v216_v25, %v206_v22  ;;  %v226_v34 = vsub.s32 (!%p138_p2), %v223_v26, %v206_v22 }
   0xc   : > { %524 = vmatpush3.bf16.msra.mxu0 (!%p138_p2), %v523_v18 }
   0xd   : > { %s647_s13 = smov (!%p161_p3, %s479_s13), 1 }
   0xe   : > { %s494_s14 = sshll.u32 %s647_s13, 6 }
   0xf   : > { %s165_s17 = scalar_lea.vmem %s642_s0, %s494_s14  ;;  %s170_s30 = scalar_lea.vmem %s645_s3, %s494_s14 }
  0x10   : > { %v587_v0 = vld [vmem:[%s165_s17] sm:$0xff]  ;;  %v589_v1 = vld [vmem:[%s165_s17 + $0x8] sm:$0xff]  ;;  %v597_v5 = vld [vmem:[%s165_s17 + $0x10] sm:$0xff] }
  0x11   : > { %v591_v2 = vld [vmem:[%s165_s17 + $0x20] sm:$0xff]  ;;  %v179_v3 = vadd.f32 %v589_v1, %v587_v0  ;;  %v595_v4 = vld [vmem:[%s165_s17 + $0x28] sm:$0xff]  ;;  %v599_v6 = vld [vmem:[%s165_s17 + $0x18] sm:$0xff] }
  0x12   : > { %v185_v7 = vadd.f32 %v595_v4, %v591_v2  ;;  %v603_v8 = vld [vmem:[%s165_s17 + $0x30] sm:$0xff]  ;;  %v605_v9 = vld [vmem:[%s165_s17 + $0x38] sm:$0xff]  ;;  %v182_v10 = vadd.f32 %v599_v6, %v597_v5 }
  0x13   : > { %180 = vadd.xlane.f32.xlu0 %v179_v3  ;;  %v188_v11 = vadd.f32 %v605_v9, %v603_v8 }
  0x14   : > { %186 = vadd.xlane.f32.xlu1 %v185_v7 }
  0x17   : > { %183 = vadd.xlane.f32.xlu0 %v182_v10 }
  0x18   : > { %189 = vadd.xlane.f32.xlu1 %v188_v11 }
  0xa0   : > { %v181_v24 = vpop.xlane.xlu0 %180 }
  0xa1   : > { %v187_v27 = vpop.xlane.xlu1 %186  ;;  %v191_v29 = vmul.f32 0.00390625, %v181_v24 }
  0xa2   : > { %v193_v32 = vmul.f32 0.00390625, %v187_v27 }
  0xa3   : > { %v208_v38 = vrot.slane %v191_v29, %v207_v28 }
  0xa4   : > { %v184_v33 = vpop.xlane.xlu0 %183  ;;  %v220_v40 = vrot.slane %v193_v32, %v219_v31 }
  0xa5   : > { %v192_v35 = vmul.f32 0.00390625, %v184_v33  ;;  %v190_v36 = vpop.xlane.xlu1 %189 }
  0xa6   : > { %v194_v37 = vmul.f32 0.00390625, %v190_v36 }
  0xa7   : > { %v213_v39 = vrot.slane %v192_v35, %v212_v30 }
  0xa8   : > { %v227_v41 = vrot.slane %v194_v37, %v226_v34 }
  0xa9   : > { %v215_v42 = vsel %vm214_vm1, %v213_v39, %v208_v38 }
  0xaa   : > { %v222_v43 = vsel %vm221_vm2, %v220_v40, %v215_v42 }
  0xab   : > { %v229_v44 = vsel %vm228_vm3, %v227_v41, %v222_v43 }
  0xac   : > { %512 = vmatmul.mubr.msk.f32.vlgmr.msra.gmra.mrb[0].mxu0 %vm230_vm4, %v229_v44 }
 0x17f   : > { %v299_v46 = vpop.f32.mrb[0].mxu0 }
 0x180   : > { %v303_v47 = vmax.f32 %v299_v46, 0.0  ;;  %v513_v48 = vpop.f32.mrb[1].mxu0 }
 0x182   : > { %517 = vmatmul.mubr.msk.f32.vlgmr.msra.gmra.mrb[0].mxu1 %vm305_vm6, %v303_v47 }
 0x255   : > { %v379_v49 = vpop.f32.mrb[0].mxu1 }
 0x256   : > { %v491_v50 = vmul.f32 -1.442695, %v379_v49  ;;  %v518_v51 = vpop.f32.mrb[1].mxu1 }
 0x258   : > { %536 = vpow2.f32 %v491_v50 }
 0x262   : > { %v537_v52 = vpop.eup %536 }
 0x263   : > { %v386_v53 = vadd.f32 1.0, %v537_v52 }
 0x265   : > { %538 = vrcp.f32 %v386_v53 }
 0x26f   : > { %v539_v55 = vpop.eup %538 }
 0x270   : > { %v392_v56 = vrot.slane %v539_v55, %v391_v54 }
 0x272   : > { %398 = vbcast.lane.b32.xlu1 %v392_v56, 264  ;;  %394 = vbcast.lane.b32.xlu0 %v392_v56, 256 }
 0x276   : > { %402 = vbcast.lane.b32.xlu1 %v392_v56, 272 }
 0x27a   : > { %406 = vbcast.lane.b32.xlu1 %v392_v56, 280 }
 0x2e4   : > { %v399_v57 = vpop.permute.xlu1 %398  ;;  %v395_v58 = vpop.permute.xlu0 %394 }
 0x2e5   : > { %v410_v59 = vmul.f32 %v399_v57, %v597_v5  ;;  %v411_v60 = vmul.f32 %v399_v57, %v599_v6  ;;  %v408_v61 = vmul.f32 %v395_v58, %v587_v0  ;;  %v409_v62 = vmul.f32 %v395_v58, %v589_v1 }
 0x2e7   : > { %418 = vst [vmem:[%s170_s30 + $0x10] sm:$0xff] %v410_v59  ;;  %419 = vst [vmem:[%s170_s30 + $0x18] sm:$0xff] %v411_v60 }
 0x2e8   : > { %416 = vst [vmem:[%s170_s30] sm:$0xff] %v408_v61  ;;  %417 = vst [vmem:[%s170_s30 + $0x8] sm:$0xff] %v409_v62  ;;  %v403_v63 = vpop.permute.xlu1 %402 }
 0x2e9   : > { %v412_v3 = vmul.f32 %v403_v63, %v591_v2  ;;  %v413_v7 = vmul.f32 %v403_v63, %v595_v4 }
 0x2eb   : > { %420 = vst [vmem:[%s170_s30 + $0x20] sm:$0xff] %v412_v3  ;;  %421 = vst [vmem:[%s170_s30 + $0x28] sm:$0xff] %v413_v7 }
 0x2ec   : > { %v407_v10 = vpop.permute.xlu1 %406 }
 0x2ed   : > { %v414_v5 = vmul.f32 %v407_v10, %v603_v8  ;;  %v415_v6 = vmul.f32 %v407_v10, %v605_v9 }
 0x2ef   : > { %422 = vst [vmem:[%s170_s30 + $0x30] sm:$0xff] %v414_v5  ;;  %423 = vst [vmem:[%s170_s30 + $0x38] sm:$0xff] %v415_v6 }
 0x2f0 PF: > { %s13_s12 = sadd.s32 1, %s546_s12  }
 0x2f1   : > { %p10_p4 = scmp.ge.s32.totalorder %s13_s12, 4  }
 0x2f3   :  { %12 = sbr.rel (!%p10_p4) target bundleno = 1 (0x1), region = 62 }

</bundles_post_ra>
